<compile_context>
chip_gen: v7x
topology: tpu7x:2x2x1
jax: 0.10.0
libtpu: 0.0.40
codegen_flags: <defaults>
</compile_context>

<pallas_src>
import functools

import jax
import jax.numpy as jnp
from jax.experimental import pallas as pl
from jax.experimental.pallas import tpu as pltpu

SOFTMAX_WEIGHT = 1.0  # self.softmax_weight = 1 in the module


# ---------------------------------------------------------------------------
# Kernel
# ---------------------------------------------------------------------------
def _amp_mask_kernel(sel_ref, amp_ref, out_ref):
    # sel_ref: (1, lanes) f32 — post-softmax mask tile; its block index does not
    #          depend on the inner B*C grid axis, so it stays resident in VMEM.
    # amp_ref: (rows, lanes) input dtype; out_ref: (rows, lanes) promoted dtype.
    out_ref[...] = (amp_ref[...].astype(out_ref.dtype)
                    * sel_ref[...].astype(out_ref.dtype))   # broadcasts over rows


# ---------------------------------------------------------------------------
# Block / VMEM sizing helpers
# ---------------------------------------------------------------------------
def _vmem_limit_bytes():
    # Per-generation scoped-VMEM budget: ~64 MiB on v5e/v6e (128 MiB physical),
    # ~48 MiB on v7x (64 MiB physical).  Safe 32 MiB fallback.
    try:
        cap = int(pltpu.get_tpu_info().vmem_capacity_bytes)
        if cap > 0:
            return int(min(64 << 20, (cap * 3) // 4))
    except Exception:
        pass
    return 32 << 20


def _divisors(n):
    ds = set()
    i = 1
    while i * i <= n:
        if n % i == 0:
            ds.add(i)
            ds.add(n // i)
        i += 1
    return ds


def _row_candidates(bc):
    # full extent, or sublane-aligned (multiple-of-8) divisors of BC
    cands = {bc}
    if bc % 8 == 0:
        cands |= {8 * d for d in _divisors(bc // 8)}
    return sorted(cands, reverse=True)


def _lane_candidates(n):
    # full extent, or 128-lane-aligned divisors of N
    cands = {n}
    if n % 128 == 0:
        cands |= {128 * d for d in _divisors(n // 128)}
    return sorted(cands, reverse=True)


def _pick_blocks(bc, n, in_isz, out_isz, sel_isz, vmem_limit, target_bytes):
    """Pick a (rows, lanes) amp block for the flat (BC, N) layout.

    Blocks are full-extent along an axis or (8, 128)-aligned divisors (dense
    tiles, no ragged edges).  The double-buffered working set
    2*(in+out blocks) + 2*sel tile must fit the scoped-VMEM budget; the amp
    input block is kept near `target_bytes` when possible.
    """
    budget = max(vmem_limit - (1 << 20), 1 << 20)   # headroom for misc/semaphores
    row_cands = _row_candidates(bc)                  # descending
    lane_cands = _lane_candidates(n)                 # descending

    def fits(rows, lanes):
        return 2 * rows * lanes * (in_isz + out_isz) + 2 * lanes * sel_isz <= budget

    rows, lanes = None, None
    for cand_lanes in lane_cands:
        # when splitting the lane axis, keep contiguous runs >= 512 lanes
        if cand_lanes != n and cand_lanes < min(512, n):
            continue
        fit_rows = [r for r in row_cands if fits(r, cand_lanes)]
        if not fit_rows:
            continue
        under_target = [r for r in fit_rows if r * cand_lanes * in_isz <= target_bytes]
        rows = under_target[0] if under_target else fit_rows[-1]
        lanes = cand_lanes
        break
    if rows is None:
        # Nothing fits the scoped budget; best effort with the smallest legal
        # block (the caller raises vmem_limit_bytes to cover it).
        rows, lanes = row_cands[-1], lane_cands[-1]

    # Megacore (v7x has 2 TensorCores): prefer >= 2 grid blocks when a clean
    # split exists so both cores get work and DMA/compute can overlap.
    if (bc // rows) * (n // lanes) == 1:
        smaller_rows = [r for r in row_cands if r < rows]
        if smaller_rows:
            rows = smaller_rows[0]
        else:
            smaller_lanes = [l for l in lane_cands
                             if l < lanes and (l >= 512 or l == lane_cands[-1])]
            if smaller_lanes:
                lanes = smaller_lanes[0]
    return rows, lanes


# ---------------------------------------------------------------------------
# Forward
# ---------------------------------------------------------------------------
@functools.partial(
    jax.jit,
    static_argnames=("pad_y", "pad_x", "y_repeat", "x_repeat", "target_block_bytes"),
)
def amplitude_mask_forward(mask, amplitudes, *, pad_y, pad_x, y_repeat, x_repeat,
                           target_block_bytes=8 << 20):
    """mask: (V, 2, Ph, Pw), amplitudes: (B, C, V, H, W) -> (B, C, V, H, W).

    NOTE: the PyTorch module swaps pads in __init__ (self.pad_y = args.pad_x,
    self.pad_x = args.pad_y); callers should pass the already-swapped values.
    """
    # --- crop (guard each axis independently: a literal -0 is an empty slice)
    m = mask
    if pad_y > 0:
        m = m[:, :, pad_y:-pad_y, :]
    if pad_x > 0:
        m = m[:, :, :, pad_x:-pad_x]

    # --- softmax over the 2-channel dim, channel 1 == sigmoid(w*(l1 - l0)).
    # Computed once on the tiny cropped mask; commutes with spatial tiling.
    sel_small = jax.nn.sigmoid(
        SOFTMAX_WEIGHT * (m[:, 1] - m[:, 0]).astype(jnp.float32))   # (V, Ph', Pw')
    sel = jnp.tile(sel_small, (1, y_repeat, x_repeat))               # (V, H, W)

    B, C, V, H, W = amplitudes.shape
    assert sel.shape == (V, H, W), (sel.shape, (V, H, W))
    BC, N = B * C, V * H * W

    # PyTorch promotion: f32 mask * amplitudes -> f32 for f32/bf16/f16 amps.
    out_dtype = jnp.promote_types(jnp.float32, amplitudes.dtype)

    # Flat, lane-dense 2-D layout (free reshapes on contiguous trailing dims).
    sel2 = sel.reshape(1, N)
    amp2 = amplitudes.reshape(BC, N)

    in_isz = jnp.dtype(amplitudes.dtype).itemsize
    out_isz = jnp.dtype(out_dtype).itemsize
    sel_isz = 4

    vmem_limit = _vmem_limit_bytes()
    rows, lanes = _pick_blocks(BC, N, in_isz, out_isz, sel_isz,
                               vmem_limit, target_block_bytes)
    # Make sure the configured limit covers the double-buffered working set.
    used = 2 * rows * lanes * (in_isz + out_isz) + 2 * lanes * sel_isz
    vmem_limit = int(max(vmem_limit, used + (1 << 20)))

    grid = (N // lanes, BC // rows)   # B*C innermost -> sel tile stays resident

    cost = pl.CostEstimate(
        flops=BC * N,
        transcendentals=0,
        bytes_accessed=BC * N * (in_isz + out_isz) + N * sel_isz,
    )

    out = pl.pallas_call(
        _amp_mask_kernel,
        out_shape=jax.ShapeDtypeStruct((BC, N), out_dtype),
        grid_spec=pltpu.PrefetchScalarGridSpec(
            num_scalar_prefetch=0,
            grid=grid,
            in_specs=[
                # sel block index depends only on the lane axis -> no re-DMA
                # across the inner B*C axis.
                pl.BlockSpec((1, lanes), lambda h, b: (0, h)),
                pl.BlockSpec((rows, lanes), lambda h, b: (b, h)),
            ],
            out_specs=pl.BlockSpec((rows, lanes), lambda h, b: (b, h)),
        ),
        compiler_params=pltpu.CompilerParams(
            dimension_semantics=("parallel", "parallel"),
            vmem_limit_bytes=vmem_limit,
        ),
        cost_estimate=cost,
    )(sel2, amp2)

    return out.reshape(B, C, V, H, W)


# ---------------------------------------------------------------------------
# Pure-JAX reference (mirrors the PyTorch forward)
# ---------------------------------------------------------------------------
def _reference_forward(mask, amplitudes, *, pad_y, pad_x, y_repeat, x_repeat):
    m = mask
    if pad_y > 0:
        m = m[:, :, pad_y:-pad_y, :]
    if pad_x > 0:
        m = m[:, :, :, pad_x:-pad_x]
    m = jnp.tile(m, (1, 1, y_repeat, x_repeat))[None]             # (1, V, 2, H, W)
    sel = jax.nn.softmax(SOFTMAX_WEIGHT * m, axis=2)[:, :, 1]     # (1, V, H, W)
    return sel[:, None] * amplitudes                              # (B, C, V, H, W)


if __name__ == "__main__":
    def run_case(*, B, C, V, PH, PW, pad_y, pad_x, y_rep, x_rep, target, dtype, tol):
        H = (PH - 2 * pad_y) * y_rep
        W = (PW - 2 * pad_x) * x_rep
        key = jax.random.PRNGKey(0)
        k_mask, k_amp = jax.random.split(key)
        mask = jax.random.uniform(k_mask, (V, 2, PH, PW), dtype=jnp.float32)
        amp = jax.random.normal(k_amp, (B, C, V, H, W), dtype=jnp.float32).astype(dtype)

        out = amplitude_mask_forward(
            mask, amp, pad_y=pad_y, pad_x=pad_x, y_repeat=y_rep, x_repeat=x_rep,
            target_block_bytes=target)
        out = jax.block_until_ready(out)

        ref = _reference_forward(
            mask, amp, pad_y=pad_y, pad_x=pad_x, y_repeat=y_rep, x_repeat=x_rep)
        assert out.shape == (B, C, V, H, W), out.shape
        assert out.dtype == ref.dtype, (out.dtype, ref.dtype)
        assert jnp.allclose(out, ref, atol=tol, rtol=tol), "mismatch vs reference"

    # Multi-block grid on the B*C axis (exercises resident-sel across the inner
    # axis) with symmetric padding; small block target forces >1 row block.
    run_case(B=4, C=4, V=4, PH=10, PW=34, pad_y=1, pad_x=1, y_rep=2, x_rep=1,
             target=64 * 1024, dtype=jnp.float32, tol=1e-5)
    # One-sided padding (per-axis crop) + bf16 amplitudes (promoted f32 output);
    # small problem -> the >=2-blocks megacore split is exercised on the lane axis.
    run_case(B=2, C=2, V=4, PH=8, PW=10, pad_y=0, pad_x=1, y_rep=2, x_rep=2,
             target=8 << 20, dtype=jnp.bfloat16, tol=1e-2)
    # Default block target, f32.
    run_case(B=2, C=4, V=4, PH=10, PW=10, pad_y=1, pad_x=1, y_rep=2, x_rep=2,
             target=8 << 20, dtype=jnp.float32, tol=1e-5)

    print("KERNEL_OK")
</pallas_src>

<mosaic_0001>
module attributes {stable_mosaic.version = 11 : i64} {
  func.func @_amp_mask_kernel(%arg0: i32, %arg1: i32, %arg2: memref<1x2048xf32, #tpu.memory_space<vmem>>, %arg3: memref<8x2048xf32, #tpu.memory_space<vmem>>, %arg4: memref<8x2048xf32, #tpu.memory_space<vmem>>) attributes {dimension_semantics = [#tpu.dimension_semantics<parallel>, #tpu.dimension_semantics<parallel>], iteration_bounds = array<i64: 1, 2>, scalar_prefetch = 0 : i64, scratch_operands = 0 : i64, tpu.core_type = #tpu.core_type<tc>, window_params = [{transform_indices = @transform_0, window_bounds = array<i64: 1, 2048>}, {transform_indices = @transform_1, window_bounds = array<i64: 8, 2048>}, {transform_indices = @transform_2, window_bounds = array<i64: 8, 2048>}]} {
    %c0 = arith.constant 0 : index
    %c0_0 = arith.constant 0 : index
    %0 = vector.load %arg3[%c0, %c0_0] : memref<8x2048xf32, #tpu.memory_space<vmem>>, vector<8x2048xf32>
    %c0_1 = arith.constant 0 : index
    %c0_2 = arith.constant 0 : index
    %1 = vector.load %arg2[%c0_1, %c0_2] : memref<1x2048xf32, #tpu.memory_space<vmem>>, vector<1x2048xf32>
    %2 = vector.broadcast %1 : vector<1x2048xf32> to vector<8x2048xf32>
    %3 = arith.mulf %0, %2 : vector<8x2048xf32>
    %c0_3 = arith.constant 0 : index
    %c0_4 = arith.constant 0 : index
    %4 = vector.load %arg4[%c0_3, %c0_4] : memref<8x2048xf32, #tpu.memory_space<vmem>>, vector<8x2048xf32>
    tpu.vector_store %arg4[%c0_3, %c0_4], %3 {strides = array<i32>} : memref<8x2048xf32, #tpu.memory_space<vmem>>, vector<8x2048xf32>,
    return
  }
  func.func @transform_0(%arg0: i32, %arg1: i32) -> (i32, i32) {
    %c0_i32 = arith.constant 0 : i32
    %c0_i32_0 = arith.constant 0 : i32
    return %c0_i32, %arg0 : i32, i32
  }
  func.func @transform_1(%arg0: i32, %arg1: i32) -> (i32, i32) {
    %c0_i32 = arith.constant 0 : i32
    return %arg1, %arg0 : i32, i32
  }
  func.func @transform_2(%arg0: i32, %arg1: i32) -> (i32, i32) {
    %c0_i32 = arith.constant 0 : i32
    return %arg1, %arg0 : i32, i32
  }
}

</mosaic_0001>

<bundles_post_ra>
// kernel: amplitude_mask_forward.1
= control target key start
LH: loop header
LB: loop body
LE: loop exit
PB: predicated region body
PF: predicated region fallthrough
CT: control target
= control target key end

     0   :  { %s510_s9 = smov 0   ;;  %s512_s10 = smov 0   ;;  %s585_s0 = inlined_call_operand.vmem [shape: f32[1,2048], index: 0, kind: input, shape index: {}]   ;;  %s586_s1 = inlined_call_operand.vmem [shape: f32[16,2048], index: 1, kind: input, shape index: {}]   ;;  %s587_s2 = inlined_call_operand.vmem [shape: f32[16,2048], index: 2, kind: output, shape index: {}]  }
   0x1   :  { %s514_s11 = smov 0  }
   0x2 LB: > { %s21_s12 = sadd.s32 1, %s489_s10  ;;  %p438_p0 = scmp.ge.s32.totalorder %s493_s11, 1  ;;  %s493_s11 = sphi %s514_s11, %s12_s11   ;;  %s489_s10 = sphi %s512_s10, %s589_s10   ;;  %s485_s9 = sphi %s510_s9, %s588_s9  }
   0x3   : > { %p22_p1 = scmp.ge.s32.totalorder %s21_s12, 2  ;;  %p143_p2 = scmp.lt.s32.totalorder %s493_s11, 3 }
   0x5   : > { %s591_s12 = smov (%p22_p1, %s21_s12), 0  ;;  %p144_p3 = pnand %p438_p0, %p143_p2 }
   0x6   : > { %p183_p4 = scmp.lt.s32.totalorder (!%p144_p3), %s485_s9, 1  ;;  %v222_v0 = vlaneseq (!%p144_p3)  ;;  %v218_v2 = vld [vmem:[%s585_s0] sm:$0xff] (!%p144_p3)  ;;  %v219_v11 = vld [vmem:[%s585_s0 + $0x8] sm:$0xff] (!%p144_p3) }
   0x7   : > { %147 = sbr.rel (%p144_p3) target bundleno = 29 (0x1d), region = 28 }
   0x8   : > { %v223_v1 = vshrl.u32 (!%p144_p3), %v222_v0, 7 }
   0xa   : > { %v224_v3 = vsub.s32 (!%p144_p3), 0, %v223_v1  ;;  %v228_v4 = vsub.s32 (!%p144_p3), 1, %v223_v1  ;;  %v232_v5 = vsub.s32 (!%p144_p3), 2, %v223_v1  ;;  %v236_v6 = vsub.s32 (!%p144_p3), 3, %v223_v1 }
   0xb   : > { %v240_v7 = vsub.s32 (!%p144_p3), 4, %v223_v1  ;;  %v244_v8 = vsub.s32 (!%p144_p3), 5, %v223_v1  ;;  %v248_v9 = vsub.s32 (!%p144_p3), 6, %v223_v1  ;;  %v252_v10 = vsub.s32 (!%p144_p3), 7, %v223_v1 }
   0xc   : > { %v225_v13 = vrot.slane (!%p144_p3), %v218_v2, %v224_v3  ;;  %v229_v15 = vrot.slane (!%p144_p3), %v218_v2, %v228_v4  ;;  %v233_v17 = vrot.slane (!%p144_p3), %v218_v2, %v232_v5  ;;  %v237_v18 = vrot.slane (!%p144_p3), %v218_v2, %v236_v6 }
   0xd   : > { %v241_v21 = vrot.slane (!%p144_p3), %v218_v2, %v240_v7  ;;  %v245_v23 = vrot.slane (!%p144_p3), %v218_v2, %v244_v8  ;;  %v249_v24 = vrot.slane (!%p144_p3), %v218_v2, %v248_v9  ;;  %v253_v25 = vrot.slane (!%p144_p3), %v218_v2, %v252_v10 }
   0xe   : > { %s593_s9 = smov (!%p183_p4, %s485_s9), 1  ;;  %v257_v40 = vrot.slane %v219_v11, %v224_v3  ;;  %v261_v41 = vrot.slane %v219_v11, %v228_v4  ;;  %v265_v42 = vrot.slane %v219_v11, %v232_v5  ;;  %v269_v43 = vrot.slane %v219_v11, %v236_v6 }
   0xf   : > { %s445_s15 = sshll.u32 %s593_s9, 7  ;;  %v273_v47 = vrot.slane %v219_v11, %v240_v7  ;;  %v277_v48 = vrot.slane %v219_v11, %v244_v8  ;;  %v281_v49 = vrot.slane %v219_v11, %v248_v9  ;;  %v285_v51 = vrot.slane %v219_v11, %v252_v10 }
  0x10   : > { %s534_s18 = scalar_lea.vmem %s586_s1, %s445_s15  ;;  %s545_s23 = scalar_lea.vmem %s587_s2, %s445_s15 }
  0x11   : > { %v202_v12 = vld [vmem:[%s534_s18] sm:$0xff]  ;;  %v203_v14 = vld [vmem:[%s534_s18 + $0x8] sm:$0xff]  ;;  %v204_v16 = vld [vmem:[%s534_s18 + $0x10] sm:$0xff] }
  0x12   : > { %v205_v19 = vld [vmem:[%s534_s18 + $0x18] sm:$0xff]  ;;  %v206_v20 = vld [vmem:[%s534_s18 + $0x20] sm:$0xff]  ;;  %v207_v22 = vld [vmem:[%s534_s18 + $0x28] sm:$0xff]  ;;  %v302_v26 = vmul.f32 %v225_v13, %v202_v12  ;;  %v303_v27 = vmul.f32 %v229_v15, %v203_v14  ;;  %v304_v28 = vmul.f32 %v233_v17, %v204_v16 }
  0x13   : > { %v305_v29 = vmul.f32 %v237_v18, %v205_v19  ;;  %v208_v30 = vld [vmem:[%s534_s18 + $0x30] sm:$0xff]  ;;  %v209_v31 = vld [vmem:[%s534_s18 + $0x38] sm:$0xff]  ;;  %v210_v32 = vld [vmem:[%s534_s18 + $0x40] sm:$0xff]  ;;  %v306_v33 = vmul.f32 %v241_v21, %v206_v20  ;;  %v307_v34 = vmul.f32 %v245_v23, %v207_v22 }
  0x14   : > { %v308_v35 = vmul.f32 %v249_v24, %v208_v30  ;;  %v309_v36 = vmul.f32 %v253_v25, %v209_v31  ;;  %v211_v37 = vld [vmem:[%s534_s18 + $0x48] sm:$0xff]  ;;  %v212_v38 = vld [vmem:[%s534_s18 + $0x50] sm:$0xff]  ;;  %v213_v39 = vld [vmem:[%s534_s18 + $0x58] sm:$0xff]  ;;  %318 = vst [vmem:[%s545_s23] sm:$0xff] %v302_v26  ;;  %v310_v52 = vmul.f32 %v257_v40, %v210_v32 }
  0x15   : > { %319 = vst [vmem:[%s545_s23 + $0x8] sm:$0xff] %v303_v27  ;;  %320 = vst [vmem:[%s545_s23 + $0x10] sm:$0xff] %v304_v28  ;;  %v214_v44 = vld [vmem:[%s534_s18 + $0x60] sm:$0xff]  ;;  %v215_v45 = vld [vmem:[%s534_s18 + $0x68] sm:$0xff]  ;;  %v311_v53 = vmul.f32 %v261_v41, %v211_v37  ;;  %v312_v54 = vmul.f32 %v265_v42, %v212_v38  ;;  %v313_v55 = vmul.f32 %v269_v43, %v213_v39 }
  0x16   : > { %321 = vst [vmem:[%s545_s23 + $0x18] sm:$0xff] %v305_v29  ;;  %v216_v46 = vld [vmem:[%s534_s18 + $0x70] sm:$0xff]  ;;  %322 = vst [vmem:[%s545_s23 + $0x20] sm:$0xff] %v306_v33  ;;  %v217_v50 = vld [vmem:[%s534_s18 + $0x78] sm:$0xff]  ;;  %v314_v56 = vmul.f32 %v273_v47, %v214_v44  ;;  %v315_v57 = vmul.f32 %v277_v48, %v215_v45 }
  0x17   : > { %323 = vst [vmem:[%s545_s23 + $0x28] sm:$0xff] %v307_v34  ;;  %324 = vst [vmem:[%s545_s23 + $0x30] sm:$0xff] %v308_v35  ;;  %v316_v58 = vmul.f32 %v281_v49, %v216_v46  ;;  %v317_v59 = vmul.f32 %v285_v51, %v217_v50 }
  0x18   : > { %325 = vst [vmem:[%s545_s23 + $0x38] sm:$0xff] %v309_v36  ;;  %326 = vst [vmem:[%s545_s23 + $0x40] sm:$0xff] %v310_v52 }
  0x19   : > { %327 = vst [vmem:[%s545_s23 + $0x48] sm:$0xff] %v311_v53  ;;  %328 = vst [vmem:[%s545_s23 + $0x50] sm:$0xff] %v312_v54 }
  0x1a   : > { %329 = vst [vmem:[%s545_s23 + $0x58] sm:$0xff] %v313_v55  ;;  %330 = vst [vmem:[%s545_s23 + $0x60] sm:$0xff] %v314_v56 }
  0x1b   : > { %331 = vst [vmem:[%s545_s23 + $0x68] sm:$0xff] %v315_v57  ;;  %332 = vst [vmem:[%s545_s23 + $0x70] sm:$0xff] %v316_v58 }
  0x1c   : > { %333 = vst [vmem:[%s545_s23 + $0x78] sm:$0xff] %v317_v59 }
  0x1d PF: > { %s12_s11 = sadd.s32 1, %s493_s11   ;;  %s588_s9 = smov %s489_s10 }
  0x1e   : > { %p9_p5 = scmp.ge.s32.totalorder %s12_s11, 4   ;;  %s589_s10 = smov %s591_s12 }
  0x20   :  { %11 = sbr.rel (!%p9_p5) target bundleno = 2 (0x2), region = 61 }

</bundles_post_ra>
